<compile_context>
chip_gen: v6e
topology: v6e:2x2x1
jax: 0.10.0
libtpu: 0.0.40
codegen_flags: <defaults>
</compile_context>

<pallas_src>
import functools

import jax
import jax.numpy as jnp
import numpy as np
from jax import lax
from jax.experimental import pallas as pl
from jax.experimental.pallas import tpu as pltpu

LN_EPS = 1e-5   # PyTorch nn.LayerNorm default
LANE = 128
SUBLANE = 8


def _round_up(x, m):
    return ((x + m - 1) // m) * m


def _make_kernel(in_dim, hidden_dim):
    inv_d = 1.0 / float(in_dim)
    inv_h = 1.0 / float(hidden_dim)

    def kernel(x_ref, w1_ref, b1_ref, w2_ref, b2_ref, o_ref):
        x = x_ref[...].astype(jnp.float32)

        # LayerNorm over in_dim (affine folded into W1/b1); one-pass stats.
        mu = jnp.sum(x, axis=-1, keepdims=True) * inv_d
        ex2 = jnp.sum(x * x, axis=-1, keepdims=True) * inv_d
        h = (x - mu) * lax.rsqrt(ex2 - mu * mu + LN_EPS)

        # Linear(in -> hidden) on the MXU (f32 accumulate) + ReLU.
        h = jnp.dot(h, w1_ref[...], preferred_element_type=jnp.float32) + b1_ref[...]
        h = jnp.maximum(h, 0.0)

        # LayerNorm over hidden_dim (affine folded into W2/b2).
        mu2 = jnp.sum(h, axis=-1, keepdims=True) * inv_h
        eh2 = jnp.sum(h * h, axis=-1, keepdims=True) * inv_h
        h = (h - mu2) * lax.rsqrt(eh2 - mu2 * mu2 + LN_EPS)

        # Linear(hidden -> out_padded) + positivity_func = exp.
        # Padded columns have zero weight/bias -> exp(0) = 1, sliced off by wrapper.
        y = jnp.dot(h, w2_ref[...], preferred_element_type=jnp.float32) + b2_ref[...]
        o_ref[...] = jnp.exp(y).astype(o_ref.dtype)

    return kernel


@functools.partial(jax.jit, static_argnames=("tile_m",))
def tensor_param_net(x, params, *, tile_m=1024):
    """x: (B, T, in_dim) -> (B, T, out_dim)."""
    g1, be1, w1, b1, g2, be2, w2, b2 = params
    B, T, D = x.shape
    H = w1.shape[1]
    O = w2.shape[1]
    N = B * T

    # ---- Fold LN affine params into the following Linear (exact rewrite) ----
    # (LN_plain(z)*g + beta) @ W + b  ==  LN_plain(z) @ (diag(g) W) + (beta @ W + b)
    w1f = (g1.reshape(D, 1) * w1).astype(jnp.float32)
    b1f = (be1.reshape(1, D) @ w1.astype(jnp.float32) + b1.reshape(1, H)).astype(jnp.float32)
    w2f = (g2.reshape(H, 1) * w2).astype(jnp.float32)
    b2f = (be2.reshape(1, H) @ w2.astype(jnp.float32) + b2.reshape(1, O)).astype(jnp.float32)

    # ---- Lane-dense output: pad out_dim to a multiple of 128 lanes ----------
    O_pad = _round_up(O, LANE)
    if O_pad != O:
        w2f = jnp.pad(w2f, ((0, 0), (0, O_pad - O)))
        b2f = jnp.pad(b2f, ((0, 0), (0, O_pad - O)))

    # ---- Row tiling: large tiles, but keep >=2 grid steps when possible -----
    half = _round_up(max(1, (N + 1) // 2), SUBLANE)
    tm = max(SUBLANE, min(_round_up(tile_m, SUBLANE), half))
    N_pad = _round_up(N, tm)

    x2 = x.reshape(N, D).astype(jnp.float32)
    if N_pad != N:
        # Padded rows flow through LN/Linear harmlessly (no NaNs) and are sliced off.
        x2 = jnp.pad(x2, ((0, N_pad - N), (0, 0)))

    kernel = _make_kernel(D, H)

    out = pl.pallas_call(
        kernel,
        out_shape=jax.ShapeDtypeStruct((N_pad, O_pad), jnp.float32),
        grid_spec=pl.GridSpec(
            grid=(N_pad // tm,),
            in_specs=[
                pl.BlockSpec((tm, D), lambda i: (i, 0)),      # x row tile
                pl.BlockSpec((D, H), lambda i: (0, 0)),       # W1 (in, hidden), LN1 folded
                pl.BlockSpec((1, H), lambda i: (0, 0)),       # b1 (folded)
                pl.BlockSpec((H, O_pad), lambda i: (0, 0)),   # W2 (hidden, out_pad), LN2 folded
                pl.BlockSpec((1, O_pad), lambda i: (0, 0)),   # b2 (folded, padded)
            ],
            out_specs=pl.BlockSpec((tm, O_pad), lambda i: (i, 0)),
        ),
        compiler_params=pltpu.CompilerParams(
            dimension_semantics=("parallel",),
            vmem_limit_bytes=64 * 1024 * 1024,
        ),
    )(x2, w1f, b1f, w2f, b2f)

    # TODO(synk): dropout is a no-op here (p=0.0 / eval mode), so it is omitted.
    return out[:N, :O].reshape(B, T, O).astype(x.dtype)


def init_params(key, in_dim, hidden_dim, out_dim, dtype=jnp.float32):
    """Deterministic synthetic parameters (shapes match nn.Linear / nn.LayerNorm).

    Gamma/beta are randomized (not the torch defaults 1/0) so the affine-folding
    path in the wrapper is actually exercised.
    """
    k1, k2, k3, k4, k5, k6, k7, k8 = jax.random.split(key, 8)
    lim1 = 1.0 / np.sqrt(in_dim)
    lim2 = 1.0 / np.sqrt(hidden_dim)
    # nn.Linear-like init, stored pre-transposed: (in_features, out_features)
    w1 = jax.random.uniform(k1, (in_dim, hidden_dim), dtype, -lim1, lim1)
    b1 = jax.random.uniform(k2, (1, hidden_dim), dtype, -lim1, lim1)
    w2 = jax.random.uniform(k3, (hidden_dim, out_dim), dtype, -lim2, lim2)
    b2 = jax.random.uniform(k4, (1, out_dim), dtype, -lim2, lim2)
    # LayerNorm affine params
    g1 = 1.0 + 0.1 * jax.random.normal(k5, (1, in_dim), dtype)
    be1 = 0.1 * jax.random.normal(k6, (1, in_dim), dtype)
    g2 = 1.0 + 0.1 * jax.random.normal(k7, (1, hidden_dim), dtype)
    be2 = 0.1 * jax.random.normal(k8, (1, hidden_dim), dtype)
    return (g1, be1, w1, b1, g2, be2, w2, b2)


def reference_forward(x, params):
    """Pure-JAX reference of the same torch module (eval mode, dropout=0)."""
    g1, be1, w1, b1, g2, be2, w2, b2 = params

    def ln(z, g, b):
        mu = jnp.mean(z, axis=-1, keepdims=True)
        var = jnp.mean((z - mu) ** 2, axis=-1, keepdims=True)
        return (z - mu) * lax.rsqrt(var + LN_EPS) * g + b

    h = ln(x.astype(jnp.float32), g1, be1)
    h = h @ w1 + b1
    h = jnp.maximum(h, 0.0)
    h = ln(h, g2, be2)
    y = h @ w2 + b2
    return jnp.exp(y)


if __name__ == "__main__":
    in_dim, hidden_dim, out_dim = 32, 32, 16
    B, T = 2, 8

    key = jax.random.PRNGKey(0)
    kx, kp = jax.random.split(key)
    x = jax.random.normal(kx, (B, T, in_dim), jnp.float32)
    params = init_params(kp, in_dim, hidden_dim, out_dim)

    out = tensor_param_net(x, params, tile_m=1024)
    out = jax.block_until_ready(out)

    ref = reference_forward(x, params)
    np.testing.assert_allclose(np.asarray(out), np.asarray(ref), rtol=1e-4, atol=1e-5)

    print("KERNEL_OK")
</pallas_src>

<mosaic_0001>
module attributes {stable_mosaic.version = 11 : i64} {
  func.func @kernel(%arg0: i32, %arg1: memref<8x32xf32, #tpu.memory_space<vmem>>, %arg2: memref<32x32xf32, #tpu.memory_space<vmem>>, %arg3: memref<1x32xf32, #tpu.memory_space<vmem>>, %arg4: memref<32x128xf32, #tpu.memory_space<vmem>>, %arg5: memref<1x128xf32, #tpu.memory_space<vmem>>, %arg6: memref<8x128xf32, #tpu.memory_space<vmem>>) attributes {dimension_semantics = [#tpu.dimension_semantics<parallel>], iteration_bounds = array<i64: 2>, scalar_prefetch = 0 : i64, scratch_operands = 0 : i64, tpu.core_type = #tpu.core_type<tc>, window_params = [{transform_indices = @transform_0, window_bounds = array<i64: 8, 32>}, {pipeline_mode = #tpu.pipeline_mode<synchronous>, transform_indices = @transform_1, window_bounds = array<i64: 32, 32>}, {pipeline_mode = #tpu.pipeline_mode<synchronous>, transform_indices = @transform_2, window_bounds = array<i64: 1, 32>}, {pipeline_mode = #tpu.pipeline_mode<synchronous>, transform_indices = @transform_3, window_bounds = array<i64: 32, 128>}, {pipeline_mode = #tpu.pipeline_mode<synchronous>, transform_indices = @transform_4, window_bounds = array<i64: 1, 128>}, {transform_indices = @transform_5, window_bounds = array<i64: 8, 128>}]} {
    %c0 = arith.constant 0 : index
    %c0_0 = arith.constant 0 : index
    %0 = vector.load %arg1[%c0, %c0_0] : memref<8x32xf32, #tpu.memory_space<vmem>>, vector<8x32xf32>
    %cst = arith.constant dense<0.000000e+00> : vector<8xf32>
    %1 = vector.multi_reduction <add>, %0, %cst [1] : vector<8x32xf32> to vector<8xf32>
    %2 = vector.shape_cast %1 : vector<8xf32> to vector<8x1xf32>
    %cst_1 = arith.constant 3.125000e-02 : f32
    %3 = vector.broadcast %cst_1 : f32 to vector<8x1xf32>
    %4 = arith.mulf %2, %3 : vector<8x1xf32>
    %5 = arith.mulf %0, %0 : vector<8x32xf32>
    %cst_2 = arith.constant dense<0.000000e+00> : vector<8xf32>
    %6 = vector.multi_reduction <add>, %5, %cst_2 [1] : vector<8x32xf32> to vector<8xf32>
    %7 = vector.shape_cast %6 : vector<8xf32> to vector<8x1xf32>
    %cst_3 = arith.constant 3.125000e-02 : f32
    %8 = vector.broadcast %cst_3 : f32 to vector<8x1xf32>
    %9 = arith.mulf %7, %8 : vector<8x1xf32>
    %10 = vector.broadcast %4 : vector<8x1xf32> to vector<8x32xf32>
    %11 = arith.subf %0, %10 : vector<8x32xf32>
    %12 = arith.mulf %4, %4 : vector<8x1xf32>
    %13 = arith.subf %9, %12 : vector<8x1xf32>
    %cst_4 = arith.constant 9.99999974E-6 : f32
    %14 = vector.broadcast %cst_4 : f32 to vector<8x1xf32>
    %15 = arith.addf %13, %14 : vector<8x1xf32>
    %16 = math.rsqrt %15 : vector<8x1xf32>
    %17 = vector.broadcast %16 : vector<8x1xf32> to vector<8x32xf32>
    %18 = arith.mulf %11, %17 : vector<8x32xf32>
    %c0_5 = arith.constant 0 : index
    %c0_6 = arith.constant 0 : index
    %19 = vector.load %arg2[%c0_5, %c0_6] : memref<32x32xf32, #tpu.memory_space<vmem>>, vector<32x32xf32>
    %cst_7 = arith.constant dense<0.000000e+00> : vector<8x32xf32>
    %20 = tpu.matmul %18, %19, %cst_7 {dimension_numbers = #tpu.dot_dimension_numbers<[1], [0], [0], [1], [0, 0, 1, 1], [], []>} : vector<8x32xf32>, vector<32x32xf32>, vector<8x32xf32> -> vector<8x32xf32>
    %c0_8 = arith.constant 0 : index
    %c0_9 = arith.constant 0 : index
    %21 = vector.load %arg3[%c0_8, %c0_9] : memref<1x32xf32, #tpu.memory_space<vmem>>, vector<1x32xf32>
    %22 = vector.broadcast %21 : vector<1x32xf32> to vector<8x32xf32>
    %23 = arith.addf %20, %22 : vector<8x32xf32>
    %cst_10 = arith.constant 0.000000e+00 : f32
    %24 = vector.broadcast %cst_10 : f32 to vector<8x32xf32>
    %25 = arith.maximumf %23, %24 : vector<8x32xf32>
    %cst_11 = arith.constant dense<0.000000e+00> : vector<8xf32>
    %26 = vector.multi_reduction <add>, %25, %cst_11 [1] : vector<8x32xf32> to vector<8xf32>
    %27 = vector.shape_cast %26 : vector<8xf32> to vector<8x1xf32>
    %cst_12 = arith.constant 3.125000e-02 : f32
    %28 = vector.broadcast %cst_12 : f32 to vector<8x1xf32>
    %29 = arith.mulf %27, %28 : vector<8x1xf32>
    %30 = arith.mulf %25, %25 : vector<8x32xf32>
    %cst_13 = arith.constant dense<0.000000e+00> : vector<8xf32>
    %31 = vector.multi_reduction <add>, %30, %cst_13 [1] : vector<8x32xf32> to vector<8xf32>
    %32 = vector.shape_cast %31 : vector<8xf32> to vector<8x1xf32>
    %cst_14 = arith.constant 3.125000e-02 : f32
    %33 = vector.broadcast %cst_14 : f32 to vector<8x1xf32>
    %34 = arith.mulf %32, %33 : vector<8x1xf32>
    %35 = vector.broadcast %29 : vector<8x1xf32> to vector<8x32xf32>
    %36 = arith.subf %25, %35 : vector<8x32xf32>
    %37 = arith.mulf %29, %29 : vector<8x1xf32>
    %38 = arith.subf %34, %37 : vector<8x1xf32>
    %cst_15 = arith.constant 9.99999974E-6 : f32
    %39 = vector.broadcast %cst_15 : f32 to vector<8x1xf32>
    %40 = arith.addf %38, %39 : vector<8x1xf32>
    %41 = math.rsqrt %40 : vector<8x1xf32>
    %42 = vector.broadcast %41 : vector<8x1xf32> to vector<8x32xf32>
    %43 = arith.mulf %36, %42 : vector<8x32xf32>
    %c0_16 = arith.constant 0 : index
    %c0_17 = arith.constant 0 : index
    %44 = vector.load %arg4[%c0_16, %c0_17] : memref<32x128xf32, #tpu.memory_space<vmem>>, vector<32x128xf32>
    %cst_18 = arith.constant dense<0.000000e+00> : vector<8x128xf32>
    %45 = tpu.matmul %43, %44, %cst_18 {dimension_numbers = #tpu.dot_dimension_numbers<[1], [0], [0], [1], [0, 0, 1, 1], [], []>} : vector<8x32xf32>, vector<32x128xf32>, vector<8x128xf32> -> vector<8x128xf32>
    %c0_19 = arith.constant 0 : index
    %c0_20 = arith.constant 0 : index
    %46 = vector.load %arg5[%c0_19, %c0_20] : memref<1x128xf32, #tpu.memory_space<vmem>>, vector<1x128xf32>
    %47 = vector.broadcast %46 : vector<1x128xf32> to vector<8x128xf32>
    %48 = arith.addf %45, %47 : vector<8x128xf32>
    %49 = math.exp %48 : vector<8x128xf32>
    %c0_21 = arith.constant 0 : index
    %c0_22 = arith.constant 0 : index
    %50 = vector.load %arg6[%c0_21, %c0_22] : memref<8x128xf32, #tpu.memory_space<vmem>>, vector<8x128xf32>
    tpu.vector_store %arg6[%c0_21, %c0_22], %49 {strides = array<i32>} : memref<8x128xf32, #tpu.memory_space<vmem>>, vector<8x128xf32>,
    return
  }
  func.func @transform_0(%arg0: i32) -> (i32, i32) {
    %c0_i32 = arith.constant 0 : i32
    %c0_i32_0 = arith.constant 0 : i32
    return %arg0, %c0_i32 : i32, i32
  }
  func.func @transform_1(%arg0: i32) -> (i32, i32) {
    %c0_i32 = arith.constant 0 : i32
    %c0_i32_0 = arith.constant 0 : i32
    %c0_i32_1 = arith.constant 0 : i32
    return %c0_i32, %c0_i32_0 : i32, i32
  }
  func.func @transform_2(%arg0: i32) -> (i32, i32) {
    %c0_i32 = arith.constant 0 : i32
    %c0_i32_0 = arith.constant 0 : i32
    %c0_i32_1 = arith.constant 0 : i32
    return %c0_i32, %c0_i32_0 : i32, i32
  }
  func.func @transform_3(%arg0: i32) -> (i32, i32) {
    %c0_i32 = arith.constant 0 : i32
    %c0_i32_0 = arith.constant 0 : i32
    %c0_i32_1 = arith.constant 0 : i32
    return %c0_i32, %c0_i32_0 : i32, i32
  }
  func.func @transform_4(%arg0: i32) -> (i32, i32) {
    %c0_i32 = arith.constant 0 : i32
    %c0_i32_0 = arith.constant 0 : i32
    %c0_i32_1 = arith.constant 0 : i32
    return %c0_i32, %c0_i32_0 : i32, i32
  }
  func.func @transform_5(%arg0: i32) -> (i32, i32) {
    %c0_i32 = arith.constant 0 : i32
    %c0_i32_0 = arith.constant 0 : i32
    return %arg0, %c0_i32 : i32, i32
  }
}

</mosaic_0001>

<bundles_post_ra>
// kernel: tensor_param_net.1
= control target key start
LH: loop header
LB: loop body
LE: loop exit
PB: predicated region body
PF: predicated region fallthrough
CT: control target
= control target key end

     0   :  { %s578_s18 = smov 0   ;;  %s638_s0 = inlined_call_operand.vmem [shape: f32[16,32], index: 0, kind: input, shape index: {}]   ;;  %s639_s1 = inlined_call_operand.vmem [shape: f32[32,32], index: 1, kind: input, shape index: {}]   ;;  %s640_s2 = inlined_call_operand.vmem [shape: f32[1,32], index: 2, kind: input, shape index: {}]   ;;  %s641_s3 = inlined_call_operand.vmem [shape: f32[32,128], index: 3, kind: input, shape index: {}]   ;;  %s642_s4 = inlined_call_operand.vmem [shape: f32[1,128], index: 4, kind: input, shape index: {}]   ;;  %s643_s5 = inlined_call_operand.vmem [shape: f32[16,128], index: 5, kind: output, shape index: {}]  }
   0x1 LB: > { %s477_s19 = sadd.s32 4294967295, %s544_s18   ;;  %p481_p0 = scmp.ge.s32.totalorder %s544_s18, 1  ;;  %s544_s18 = sphi %s578_s18, %s15_s18  }
   0x2   : > { %p186_p1 = scmp.lt.s32.totalorder %s544_s18, 3 }
   0x4   : > { %p187_p2 = pnand %p481_p0, %p186_p1 }
   0x5   : > { %p212_p3 = scmp.lt.s32.totalorder (!%p187_p2), %s477_s19, 1 }
   0x6   : > { %190 = sbr.rel (%p187_p2) target bundleno = 754 (0x2f2), region = 40 }
   0xb   : > { %s645_s19 = smov (!%p212_p3, %s477_s19), 1  ;;  %vm221_vm0 = vcmask 261120   ;;  %v240_v4 = vld [vmem:[%s639_s1 + $0x18] sm:$0xff]  ;;  %v546_v5 = vmov 0.0   ;;  %v239_v6 = vld [vmem:[%s639_s1 + $0x10] sm:$0xff]  ;;  %vm547_vm1 = vmmov 0  }
   0xc   : > { %s482_s20 = sshll.u32 %s645_s19, 3  ;;  %500 = vmatprep.subr.mxu0 %v546_v5  ;;  %508 = vmatprep.mubr.msk.f32.mxu0 %vm547_vm1, %v546_v5  ;;  %v238_v7 = vld [vmem:[%s639_s1 + $0x8] sm:$0xff]  ;;  %v237_v8 = vld [vmem:[%s639_s1] sm:$0xff]  ;;  %v340_v27 = vld [vmem:[%s641_s3 + $0x18] sm:$0xff] }
   0xd   : > { %s215_s23 = scalar_lea.vmem %s638_s0, %s482_s20  ;;  %501 = vmatpush3.msra.mxu0 %v240_v4  ;;  %511 = vmatprep.subr.mxu1 %v546_v5  ;;  %v484_v19 = vld [vmem:[%s640_s2] ss:$0 sm:$0xff]  ;;  %v339_v28 = vld [vmem:[%s641_s3 + $0x10] sm:$0xff]  ;;  %v338_v29 = vld [vmem:[%s641_s3 + $0x8] sm:$0xff]  ;;  %s219_s24 = scalar_lea.vmem %s643_s5, %s482_s20 }
   0xe   : > { %v220_v0 = vld [vmem:[%s215_s23] sm:$0xff]  ;;  %502 = vmatprep.subr.mxu0 %v546_v5  ;;  %519 = vmatprep.mubr.msk.f32.mxu1 %vm547_vm1, %v546_v5 }
   0xf   : > { %v222_v1 = vsel %vm221_vm0, %v220_v0, 0.0  ;;  %v226_v2 = vmul.f32 %v220_v0, %v220_v0  ;;  %503 = vmatpush3.msra.mxu0 %v239_v6  ;;  %512 = vmatpush3.msra.mxu1 %v340_v27  ;;  %v337_v30 = vld [vmem:[%s641_s3] sm:$0xff] }
  0x10   : > { %223 = vadd.xlane.f32.xlu0 %v222_v1  ;;  %504 = vmatprep.subr.mxu0 %v546_v5  ;;  %v486_v41 = vld [vmem:[%s642_s4] ss:$0 sm:$0xff] }
  0x11   : > { %v227_v3 = vsel %vm221_vm0, %v226_v2, 0.0  ;;  %505 = vmatpush3.msra.mxu0 %v238_v7  ;;  %513 = vmatprep.subr.mxu1 %v546_v5 }
  0x12   : > { %506 = vmatprep.subr.mxu0 %v546_v5  ;;  %514 = vmatpush3.msra.mxu1 %v339_v28 }
  0x13   : > { %507 = vmatpush3.msra.mxu0 %v237_v8  ;;  %515 = vmatprep.subr.mxu1 %v546_v5 }
  0x14   : > { %228 = vadd.xlane.f32.xlu0 %v227_v3  ;;  %516 = vmatpush3.msra.mxu1 %v338_v29 }
  0x15   : > { %517 = vmatprep.subr.mxu1 %v546_v5 }
  0x16   : > { %518 = vmatpush3.msra.mxu1 %v337_v30 }
  0x99   : > { %v224_v9 = vpop.xlane.xlu0 %223 }
  0x9a   : > { %v225_v10 = vmul.f32 0.03125, %v224_v9 }
  0x9c   : > { %v232_v12 = vmul.f32 %v225_v10, %v225_v10  ;;  %v231_v16 = vsub.f32 %v220_v0, %v225_v10 }
  0x9d   : > { %v229_v11 = vpop.xlane.xlu0 %228 }
  0x9e   : > { %v230_v13 = vmul.f32 0.03125, %v229_v11 }
  0xa0   : > { %v233_v14 = vsub.f32 %v230_v13, %v232_v12 }
  0xa2   : > { %v234_v15 = vadd.f32 1e-05, %v233_v14 }
  0xa4   : > { %532 = vrsqrt.f32 %v234_v15 }
  0xb1   : > { %v533_v17 = vpop.eup %532 }
  0xb2   : > { %v236_v18 = vmul.f32 %v533_v17, %v231_v16 }
  0xb4   : > { %509 = vmatmul.mubr.msk.f32.vlgmr.msra.gmra.mxu0 %vm221_vm0, %v236_v18 }
 0x174   : > { %v317_v20 = vpop.f32.mrf.mxu0 }
 0x175   : > { %v318_v21 = vadd.f32 %v484_v19, %v317_v20 }
 0x176   : > { %v510_v22 = vpop.f32.mrf.mxu0 }
 0x177   : > { %v321_v23 = vmax.f32 %v318_v21, 0.0 }
 0x179   : > { %v322_v24 = vsel %vm221_vm0, %v321_v23, 0.0  ;;  %v326_v25 = vmul.f32 %v321_v23, %v321_v23 }
 0x17a   : > { %323 = vadd.xlane.f32.xlu1 %v322_v24 }
 0x17b   : > { %v327_v26 = vsel %vm221_vm0, %v326_v25, 0.0 }
 0x17e   : > { %328 = vadd.xlane.f32.xlu1 %v327_v26 }
 0x203   : > { %v324_v31 = vpop.xlane.xlu1 %323 }
 0x204   : > { %v325_v32 = vmul.f32 0.03125, %v324_v31 }
 0x206   : > { %v332_v34 = vmul.f32 %v325_v32, %v325_v32  ;;  %v331_v38 = vsub.f32 %v321_v23, %v325_v32 }
 0x207   : > { %v329_v33 = vpop.xlane.xlu1 %328 }
 0x208   : > { %v330_v35 = vmul.f32 0.03125, %v329_v33 }
 0x20a   : > { %v333_v36 = vsub.f32 %v330_v35, %v332_v34 }
 0x20c   : > { %v334_v37 = vadd.f32 1e-05, %v333_v36 }
 0x20e   : > { %534 = vrsqrt.f32 %v334_v37 }
 0x21b   : > { %v535_v39 = vpop.eup %534 }
 0x21c   : > { %v336_v40 = vmul.f32 %v535_v39, %v331_v38 }
 0x21e   : > { %520 = vmatmul.mubr.msk.f32.vlgmr.msra.gmra.mxu1 %vm221_vm0, %v336_v40 }
 0x2de   : > { %v417_v42 = vpop.f32.mrf.mxu1 }
 0x2df   : > { %v418_v43 = vadd.f32 %v486_v41, %v417_v42 }
 0x2e0   : > { %v521_v44 = vpop.f32.mrf.mxu1 }
 0x2e1   : > { %v421_v45 = vmul.f32 1.442695, %v418_v43 }
 0x2e3   : > { %536 = vpow2.f32 %v421_v45 }
 0x2f0   : > { %v537_v46 = vpop.eup %536 }
 0x2f1   : > { %423 = vst [vmem:[%s219_s24] sm:$0xff] %v537_v46 }
 0x2f2 PF: > { %s15_s18 = sadd.s32 1, %s544_s18  }
 0x2f3   : > { %p12_p4 = scmp.ge.s32.totalorder %s15_s18, 4  }
 0x2f5   :  { %14 = sbr.rel (!%p12_p4) target bundleno = 1 (0x1), region = 70 }

</bundles_post_ra>
